<compile_context>
chip_gen: v6e
topology: v6e:2x2x1
jax: 0.10.0
libtpu: 0.0.40
codegen_flags: <defaults>
</compile_context>

<pallas_src>
import functools
import math

import numpy as np
import jax
import jax.numpy as jnp
from jax.experimental import pallas as pl
from jax.experimental.pallas import tpu as pltpu

WINDOW_SIZE = 11
SIGMA = 1.5
MAX_VAL = 1.0
C1 = (0.01 * MAX_VAL) ** 2
C2 = (0.03 * MAX_VAL) ** 2

MXU_M = 256  # target contraction extent for the row-conv matmul (safe for v5e..v7x)


def _round_up(x: int, mult: int) -> int:
    return -(-x // mult) * mult


# ---------------------------------------------------------------------------
# Filter construction (host-side numpy -> baked constants, no XLA op chain)
# ---------------------------------------------------------------------------
def _gaussian_1d(window_size: int, sigma: float) -> np.ndarray:
    x = np.arange(window_size, dtype=np.float64) - (window_size // 2)
    g = np.exp(-(x ** 2) / (2.0 * sigma ** 2))
    return (g / g.sum()).astype(np.float32)


def _banded_gaussian_matrix(n: int, window_size: int, sigma: float) -> np.ndarray:
    """M[i, j] = g[j - i + pad] if |j - i| <= pad else 0.

    (M @ X) is the zero-padded 'same' 1-D Gaussian conv along the rows of X and
    (X @ M.T) is the same conv along the columns.
    """
    g = _gaussian_1d(window_size, sigma)
    pad = (window_size - 1) // 2
    idx = np.arange(n)
    off = idx[None, :] - idx[:, None] + pad            # j - i + pad
    valid = (off >= 0) & (off < window_size)
    return np.where(valid, g[np.clip(off, 0, window_size - 1)], 0.0).astype(np.float32)


# ---------------------------------------------------------------------------
# Pallas kernel: PB image planes (stacked along sublanes) per grid step
# ---------------------------------------------------------------------------
def _ssim_kernel(x1_ref, x2_ref, bd_ref, mwt_ref, out_ref, *,
                 pbh: int, n_valid_rows: int, need_mask: bool):
    # (PB*Hc, Wc) slab; cast to f32 in-kernel (inputs stay in their HBM dtype).
    x1 = x1_ref[...].astype(jnp.float32)
    x2 = x2_ref[...].astype(jnp.float32)
    bd = bd_ref[...]      # (PBH, PBH) block-diagonal row filter (Mh per plane)
    mwt = mwt_ref[...]    # (Wc, Wc) transposed column filter

    # Fused column conv: a single (5*PBH, Wc) x (Wc, Wc) MXU matmul covers all five
    # moment maps (amortizes the MwT weight push and lengthens the MXU stream).
    stack = jnp.concatenate([x1, x2, x1 * x1, x2 * x2, x1 * x2], axis=0)
    cols = jnp.dot(stack, mwt, preferred_element_type=jnp.float32)

    def row_conv(i):
        # Per-plane zero-padded row conv for the i-th moment map (sublane-aligned slice).
        return jnp.dot(bd, cols[i * pbh:(i + 1) * pbh, :],
                       preferred_element_type=jnp.float32)

    mu1 = row_conv(0)
    mu2 = row_conv(1)
    mu1_mu2 = mu1 * mu2
    mu1_sq = mu1 * mu1
    mu2_sq = mu2 * mu2

    # Consume each filtered slab immediately (small live set); keep the variance
    # subtractions in f32 (catastrophic-cancellation site).
    sigma12 = row_conv(4) - mu1_mu2
    num = (2.0 * mu1_mu2 + C1) * (2.0 * sigma12 + C2)
    den = (mu1_sq + mu2_sq + C1) * ((row_conv(2) - mu1_sq) + (row_conv(3) - mu2_sq) + C2)

    ssim_map = num * pl.reciprocal(den, approx=True)   # divide on the EUP slot
    loss = jnp.clip(1.0 - ssim_map, 0.0, 1.0) * 0.5

    if need_mask:
        # Exclude zero-padded planes explicitly (no reliance on approx-reciprocal giving
        # exactly ssim == 1 on all-zero data).
        row = jax.lax.broadcasted_iota(jnp.int32, loss.shape, 0)
        valid = (pl.program_id(0) * pbh + row) < n_valid_rows
        loss = jnp.where(valid, loss, 0.0)

    # One partial sum per grid step, written once (no cross-step accumulator RMW).
    out_ref[...] = jnp.sum(loss).reshape(1, 1, 1)


# ---------------------------------------------------------------------------
# Wrapper helpers
# ---------------------------------------------------------------------------
def _choose_plane_block(P: int, Hc: int, itemsize: int):
    """Pick PB (planes per grid step).

    PB*Hc is kept sublane-aligned and bounded by the MXU tile (MXU_M): the block-diagonal
    row conv wastes FLOPs linearly in PB, so we only stack enough planes to fill the MXU
    contraction dimension.  If splitting is possible, PB is reduced so G >= 2 (megacore).
    """
    align = max(8, 32 // itemsize)                    # sublane tile for this dtype
    unit = align // math.gcd(Hc, align)               # smallest PB with PB*Hc % align == 0
    pb = max(unit, (MXU_M // (unit * Hc)) * unit)     # largest unit-multiple <= MXU_M rows
    pb = min(pb, _round_up(P, unit))                  # never more than the plane count
    if pb >= P and P > unit:                          # force G >= 2 when P allows it
        pb = min(pb, _round_up(-(-P // 2), unit))
    return pb


def _vmem_capacity_bytes() -> int:
    try:
        return int(pltpu.get_tpu_info().vmem_capacity_bytes)
    except Exception:
        return 64 * 1024 * 1024                       # conservative: v7x per-TC VMEM


# ---------------------------------------------------------------------------
# Public entry point
# ---------------------------------------------------------------------------
@functools.partial(jax.jit, static_argnames=("m", "window_size"))
def ssim_loss(img1: jnp.ndarray, img2: jnp.ndarray, m: int,
              window_size: int = WINDOW_SIZE) -> jnp.ndarray:
    """Equivalent of ssim().forward(img1, img2, m) with reduction='mean'."""
    if m > 0:
        x1 = img1[..., m:-m, m:-m]
        x2 = img2[..., m:-m, m:-m]
    else:  # m == 0 would produce empty slices in the original module; treat as no crop
        x1, x2 = img1, img2

    B, C, Hc, Wc = x1.shape
    P = B * C
    dtype = x1.dtype
    itemsize = jnp.dtype(dtype).itemsize

    PB = _choose_plane_block(P, Hc, itemsize)
    PBH = PB * Hc
    G = -(-P // PB)                                   # number of grid steps
    P_pad = G * PB

    # Flatten planes onto the sublane axis; pad to a whole number of grid steps.
    x1f = x1.reshape(P * Hc, Wc)
    x2f = x2.reshape(P * Hc, Wc)
    if P_pad != P:
        zpad = jnp.zeros(((P_pad - P) * Hc, Wc), dtype=dtype)
        x1f = jnp.concatenate([x1f, zpad], axis=0)
        x2f = jnp.concatenate([x2f, zpad], axis=0)

    # Host-side numpy constants, baked into the executable.
    mh = _banded_gaussian_matrix(Hc, window_size, SIGMA)            # (Hc, Hc)
    mwt = _banded_gaussian_matrix(Wc, window_size, SIGMA).T.copy()  # (Wc, Wc)
    # Block-diagonal row filter: applies Mh independently to each of the PB planes
    # stacked along the sublane axis (no cross-plane leakage).
    bd = np.kron(np.eye(PB, dtype=np.float32), mh)                  # (PBH, PBH)

    # Per-step VMEM footprint: double-buffered inputs + (small) constants + f32 work.
    footprint = (2 * 2 * PBH * Wc * itemsize            # x1 / x2 blocks, double-buffered
                 + 2 * (PBH * PBH + Wc * Wc) * 4        # bd + mwt (tiny after MXU cap)
                 + 22 * PBH * Wc * 4)                   # stacked slab + live intermediates
    cap = _vmem_capacity_bytes()
    vmem_limit = int(max(min(max(2 * footprint, 32 << 20), cap - (16 << 20)), 16 << 20))

    kernel = functools.partial(
        _ssim_kernel, pbh=PBH, n_valid_rows=P * Hc, need_mask=(P_pad != P))

    partials = pl.pallas_call(
        kernel,
        out_shape=jax.ShapeDtypeStruct((G, 1, 1), jnp.float32),
        grid_spec=pltpu.PrefetchScalarGridSpec(
            num_scalar_prefetch=0,
            grid=(G,),
            in_specs=[
                pl.BlockSpec((PBH, Wc), lambda g: (g, 0)),
                pl.BlockSpec((PBH, Wc), lambda g: (g, 0)),
                pl.BlockSpec((PBH, PBH), lambda g: (0, 0)),   # grid-constant row filter
                pl.BlockSpec((Wc, Wc), lambda g: (0, 0)),     # grid-constant col filter
            ],
            out_specs=pl.BlockSpec((1, 1, 1), lambda g: (g, 0, 0)),
        ),
        compiler_params=pltpu.CompilerParams(
            dimension_semantics=("parallel",),        # independent steps -> megacore OK
            vmem_limit_bytes=vmem_limit,
        ),
    )(x1f, x2f, jnp.asarray(bd), jnp.asarray(mwt))

    # reduction='mean' over every element of the cropped loss map.
    return (jnp.sum(partials) / (B * C * Hc * Wc)).astype(jnp.float32)


# ---------------------------------------------------------------------------
# Pure-JAX reference (independent: direct 2-D kernel accumulation)
# ---------------------------------------------------------------------------
def ssim_loss_ref(img1, img2, m, window_size=WINDOW_SIZE):
    x1 = img1[..., m:-m, m:-m].astype(jnp.float32)
    x2 = img2[..., m:-m, m:-m].astype(jnp.float32)
    g = jnp.asarray(_gaussian_1d(window_size, SIGMA))
    k2d = jnp.outer(g, g)
    pad = (window_size - 1) // 2
    H, W = x1.shape[-2:]

    def filt(x):
        xp = jnp.pad(x, ((0, 0), (0, 0), (pad, pad), (pad, pad)))
        out = jnp.zeros_like(x)
        for p in range(window_size):
            for q in range(window_size):
                out = out + k2d[p, q] * xp[:, :, p:p + H, q:q + W]
        return out

    mu1, mu2 = filt(x1), filt(x2)
    s11 = filt(x1 * x1) - mu1 * mu1
    s22 = filt(x2 * x2) - mu2 * mu2
    s12 = filt(x1 * x2) - mu1 * mu2
    ssim_map = ((2 * mu1 * mu2 + C1) * (2 * s12 + C2)) / \
               ((mu1 * mu1 + mu2 * mu2 + C1) * (s11 + s22 + C2))
    return jnp.mean(jnp.clip(1.0 - ssim_map, 0.0, 1.0) * 0.5)


if __name__ == "__main__":
    key = jax.random.PRNGKey(0)
    k1, k2 = jax.random.split(key)
    B, Cc, H, W = 2, 4, 16, 16
    m = 2
    img1 = jax.random.uniform(k1, (B, Cc, H, W), dtype=jnp.float32)
    img2 = jax.random.uniform(k2, (B, Cc, H, W), dtype=jnp.float32)

    out = jax.block_until_ready(ssim_loss(img1, img2, m))
    ref = jax.block_until_ready(ssim_loss_ref(img1, img2, m))
    assert jnp.allclose(out, ref, atol=1e-3, rtol=1e-3), (out, ref)

    print("KERNEL_OK")
</pallas_src>

<mosaic_0001>
module attributes {stable_mosaic.version = 11 : i64} {
  func.func @_ssim_kernel(%arg0: i32, %arg1: memref<48x12xf32, #tpu.memory_space<vmem>>, %arg2: memref<48x12xf32, #tpu.memory_space<vmem>>, %arg3: memref<48x48xf32, #tpu.memory_space<vmem>>, %arg4: memref<12x12xf32, #tpu.memory_space<vmem>>, %arg5: memref<1x1x1xf32, #tpu.memory_space<vmem>>) attributes {dimension_semantics = [#tpu.dimension_semantics<parallel>], iteration_bounds = array<i64: 2>, scalar_prefetch = 0 : i64, scratch_operands = 0 : i64, tpu.core_type = #tpu.core_type<tc>, window_params = [{transform_indices = @transform_0, window_bounds = array<i64: 48, 12>}, {transform_indices = @transform_1, window_bounds = array<i64: 48, 12>}, {pipeline_mode = #tpu.pipeline_mode<synchronous>, transform_indices = @transform_2, window_bounds = array<i64: 48, 48>}, {pipeline_mode = #tpu.pipeline_mode<synchronous>, transform_indices = @transform_3, window_bounds = array<i64: 12, 12>}, {transform_indices = @transform_4, window_bounds = array<i64: 1, 1, 1>}]} {
    %c0 = arith.constant 0 : index
    %c0_0 = arith.constant 0 : index
    %0 = vector.load %arg1[%c0, %c0_0] : memref<48x12xf32, #tpu.memory_space<vmem>>, vector<48x12xf32>
    %c0_1 = arith.constant 0 : index
    %c0_2 = arith.constant 0 : index
    %1 = vector.load %arg2[%c0_1, %c0_2] : memref<48x12xf32, #tpu.memory_space<vmem>>, vector<48x12xf32>
    %c0_3 = arith.constant 0 : index
    %c0_4 = arith.constant 0 : index
    %2 = vector.load %arg3[%c0_3, %c0_4] : memref<48x48xf32, #tpu.memory_space<vmem>>, vector<48x48xf32>
    %c0_5 = arith.constant 0 : index
    %c0_6 = arith.constant 0 : index
    %3 = vector.load %arg4[%c0_5, %c0_6] : memref<12x12xf32, #tpu.memory_space<vmem>>, vector<12x12xf32>
    %4 = arith.mulf %0, %0 : vector<48x12xf32>
    %5 = arith.mulf %1, %1 : vector<48x12xf32>
    %6 = arith.mulf %0, %1 : vector<48x12xf32>
    %7 = tpu.concatenate %0, %1, %4, %5, %6 in 0 : vector<48x12xf32>, vector<48x12xf32>, vector<48x12xf32>, vector<48x12xf32>, vector<48x12xf32> -> vector<240x12xf32>
    %cst = arith.constant dense<0.000000e+00> : vector<240x12xf32>
    %8 = tpu.matmul %7, %3, %cst {dimension_numbers = #tpu.dot_dimension_numbers<[1], [0], [0], [1], [0, 0, 1, 1], [], []>} : vector<240x12xf32>, vector<12x12xf32>, vector<240x12xf32> -> vector<240x12xf32>
    %9 = vector.extract_strided_slice %8 {offsets = [0, 0], sizes = [48, 12], strides = [1, 1]} : vector<240x12xf32> to vector<48x12xf32>
    %cst_7 = arith.constant dense<0.000000e+00> : vector<48x12xf32>
    %10 = tpu.matmul %2, %9, %cst_7 {dimension_numbers = #tpu.dot_dimension_numbers<[1], [0], [0], [1], [0, 0, 1, 1], [], []>} : vector<48x48xf32>, vector<48x12xf32>, vector<48x12xf32> -> vector<48x12xf32>
    %11 = vector.extract_strided_slice %8 {offsets = [48, 0], sizes = [48, 12], strides = [1, 1]} : vector<240x12xf32> to vector<48x12xf32>
    %cst_8 = arith.constant dense<0.000000e+00> : vector<48x12xf32>
    %12 = tpu.matmul %2, %11, %cst_8 {dimension_numbers = #tpu.dot_dimension_numbers<[1], [0], [0], [1], [0, 0, 1, 1], [], []>} : vector<48x48xf32>, vector<48x12xf32>, vector<48x12xf32> -> vector<48x12xf32>
    %13 = arith.mulf %10, %12 : vector<48x12xf32>
    %14 = arith.mulf %10, %10 : vector<48x12xf32>
    %15 = arith.mulf %12, %12 : vector<48x12xf32>
    %16 = vector.extract_strided_slice %8 {offsets = [192, 0], sizes = [48, 12], strides = [1, 1]} : vector<240x12xf32> to vector<48x12xf32>
    %cst_9 = arith.constant dense<0.000000e+00> : vector<48x12xf32>
    %17 = tpu.matmul %2, %16, %cst_9 {dimension_numbers = #tpu.dot_dimension_numbers<[1], [0], [0], [1], [0, 0, 1, 1], [], []>} : vector<48x48xf32>, vector<48x12xf32>, vector<48x12xf32> -> vector<48x12xf32>
    %18 = arith.subf %17, %13 : vector<48x12xf32>
    %cst_10 = arith.constant 2.000000e+00 : f32
    %19 = vector.broadcast %cst_10 : f32 to vector<48x12xf32>
    %20 = arith.mulf %19, %13 : vector<48x12xf32>
    %cst_11 = arith.constant 9.99999974E-5 : f32
    %21 = vector.broadcast %cst_11 : f32 to vector<48x12xf32>
    %22 = arith.addf %20, %21 : vector<48x12xf32>
    %cst_12 = arith.constant 2.000000e+00 : f32
    %23 = vector.broadcast %cst_12 : f32 to vector<48x12xf32>
    %24 = arith.mulf %23, %18 : vector<48x12xf32>
    %cst_13 = arith.constant 8.99999984E-4 : f32
    %25 = vector.broadcast %cst_13 : f32 to vector<48x12xf32>
    %26 = arith.addf %24, %25 : vector<48x12xf32>
    %27 = arith.mulf %22, %26 : vector<48x12xf32>
    %28 = arith.addf %14, %15 : vector<48x12xf32>
    %cst_14 = arith.constant 9.99999974E-5 : f32
    %29 = vector.broadcast %cst_14 : f32 to vector<48x12xf32>
    %30 = arith.addf %28, %29 : vector<48x12xf32>
    %31 = vector.extract_strided_slice %8 {offsets = [96, 0], sizes = [48, 12], strides = [1, 1]} : vector<240x12xf32> to vector<48x12xf32>
    %cst_15 = arith.constant dense<0.000000e+00> : vector<48x12xf32>
    %32 = tpu.matmul %2, %31, %cst_15 {dimension_numbers = #tpu.dot_dimension_numbers<[1], [0], [0], [1], [0, 0, 1, 1], [], []>} : vector<48x48xf32>, vector<48x12xf32>, vector<48x12xf32> -> vector<48x12xf32>
    %33 = arith.subf %32, %14 : vector<48x12xf32>
    %34 = vector.extract_strided_slice %8 {offsets = [144, 0], sizes = [48, 12], strides = [1, 1]} : vector<240x12xf32> to vector<48x12xf32>
    %cst_16 = arith.constant dense<0.000000e+00> : vector<48x12xf32>
    %35 = tpu.matmul %2, %34, %cst_16 {dimension_numbers = #tpu.dot_dimension_numbers<[1], [0], [0], [1], [0, 0, 1, 1], [], []>} : vector<48x48xf32>, vector<48x12xf32>, vector<48x12xf32> -> vector<48x12xf32>
    %36 = arith.subf %35, %15 : vector<48x12xf32>
    %37 = arith.addf %33, %36 : vector<48x12xf32>
    %cst_17 = arith.constant 8.99999984E-4 : f32
    %38 = vector.broadcast %cst_17 : f32 to vector<48x12xf32>
    %39 = arith.addf %37, %38 : vector<48x12xf32>
    %40 = arith.mulf %30, %39 : vector<48x12xf32>
    %41 = tpu.reciprocal %40 {approx = true} : vector<48x12xf32> -> vector<48x12xf32>
    %42 = arith.mulf %27, %41 : vector<48x12xf32>
    %cst_18 = arith.constant 1.000000e+00 : f32
    %43 = vector.broadcast %cst_18 : f32 to vector<48x12xf32>
    %44 = arith.subf %43, %42 : vector<48x12xf32>
    %cst_19 = arith.constant 0.000000e+00 : f32
    %cst_20 = arith.constant 1.000000e+00 : f32
    %45 = vector.broadcast %cst_19 : f32 to vector<48x12xf32>
    %46 = arith.maximumf %45, %44 : vector<48x12xf32>
    %47 = vector.broadcast %cst_20 : f32 to vector<48x12xf32>
    %48 = arith.minimumf %47, %46 : vector<48x12xf32>
    %cst_21 = arith.constant 5.000000e-01 : f32
    %49 = vector.broadcast %cst_21 : f32 to vector<48x12xf32>
    %50 = arith.mulf %48, %49 : vector<48x12xf32>
    %51 = vector.shape_cast %50 : vector<48x12xf32> to vector<1x48x12xf32>
    %cst_22 = arith.constant dense<0.000000e+00> : vector<1xf32>
    %52 = vector.multi_reduction <add>, %51, %cst_22 [1, 2] : vector<1x48x12xf32> to vector<1xf32>
    %53 = vector.shape_cast %52 : vector<1xf32> to vector<1x1x1xf32>
    %54 = vector.extract %53[0, 0, 0] : f32 from vector<1x1x1xf32>
    %55 = vector.broadcast %54 : f32 to vector<1x1x1xf32>
    %c0_23 = arith.constant 0 : index
    %c0_24 = arith.constant 0 : index
    %c0_25 = arith.constant 0 : index
    %56 = vector.load %arg5[%c0_23, %c0_24, %c0_25] : memref<1x1x1xf32, #tpu.memory_space<vmem>>, vector<1x1x1xf32>
    tpu.vector_store %arg5[%c0_23, %c0_24, %c0_25], %55 {strides = array<i32>} : memref<1x1x1xf32, #tpu.memory_space<vmem>>, vector<1x1x1xf32>,
    return
  }
  func.func @transform_0(%arg0: i32) -> (i32, i32) {
    %c0_i32 = arith.constant 0 : i32
    %c0_i32_0 = arith.constant 0 : i32
    return %arg0, %c0_i32 : i32, i32
  }
  func.func @transform_1(%arg0: i32) -> (i32, i32) {
    %c0_i32 = arith.constant 0 : i32
    %c0_i32_0 = arith.constant 0 : i32
    return %arg0, %c0_i32 : i32, i32
  }
  func.func @transform_2(%arg0: i32) -> (i32, i32) {
    %c0_i32 = arith.constant 0 : i32
    %c0_i32_0 = arith.constant 0 : i32
    %c0_i32_1 = arith.constant 0 : i32
    return %c0_i32, %c0_i32_0 : i32, i32
  }
  func.func @transform_3(%arg0: i32) -> (i32, i32) {
    %c0_i32 = arith.constant 0 : i32
    %c0_i32_0 = arith.constant 0 : i32
    %c0_i32_1 = arith.constant 0 : i32
    return %c0_i32, %c0_i32_0 : i32, i32
  }
  func.func @transform_4(%arg0: i32) -> (i32, i32, i32) {
    %c0_i32 = arith.constant 0 : i32
    %c0_i32_0 = arith.constant 0 : i32
    %c0_i32_1 = arith.constant 0 : i32
    return %arg0, %c0_i32, %c0_i32_0 : i32, i32, i32
  }
}

</mosaic_0001>

<bundles_post_ra>
// kernel: ssim_loss.1
= control target key start
LH: loop header
LB: loop body
LE: loop exit
PB: predicated region body
PF: predicated region fallthrough
CT: control target
= control target key end

     0   :  { %s1657_s15 = smov 0   ;;  %s1892_s0 = inlined_call_operand.vmem [shape: f32[96,12], index: 0, kind: input, shape index: {}]   ;;  %s1893_s1 = inlined_call_operand.vmem [shape: f32[96,12], index: 1, kind: input, shape index: {}]   ;;  %s1894_s2 = inlined_call_operand.vmem [shape: f32[48,48], index: 2, kind: input, shape index: {}]   ;;  %s1895_s3 = inlined_call_operand.vmem [shape: f32[12,12], index: 3, kind: input, shape index: {}]   ;;  %s1896_s4 = inlined_call_operand.vmem [shape: f32[2,1,1], index: 4, kind: output, shape index: {}]  }
   0x1 LB: > { %s1663_s16 = sadd.s32 4294967295, %s1630_s15   ;;  %p1278_p0 = scmp.ge.s32.totalorder %s1630_s15, 1  ;;  %s1630_s15 = sphi %s1657_s15, %s14_s15  }
   0x2   : > { %p174_p1 = scmp.lt.s32.totalorder %s1630_s15, 3 }
   0x4   : > { %p175_p2 = pnand %p1278_p0, %p174_p1 }
   0x5   : > { %s203_s21 = smul.u32 (!%p175_p2), 6, %s1663_s16  ;;  %p215_p4 = scmp.lt.s32.totalorder (!%p175_p2), %s1663_s16, 1 }
   0x6   : > { %178 = sbr.rel (%p175_p2) target bundleno = 739 (0x2e3), region = 36 }
   0x7   : > { %p204_p3 = scmp.lt.s32.totalorder (!%p175_p2), %s203_s21, 11 }
   0xb   : > { %v237_v0 = vld [vmem:[%s1895_s3 + $0x8] sm:$0xf]  ;;  %vm347_vm0 = vcmask 1043456   ;;  %v236_v1 = vld [vmem:[%s1895_s3] sm:$0xff]  ;;  %s1898_s21 = smov (!%p204_p3, %s203_s21), 11  ;;  %vm256_vm1 = vcmask 97280  }
   0xc   : > { %1436 = vmatprep.subr.msk.mxu0 %vm347_vm0, %v237_v0  ;;  %s1279_s22 = sshll.u32 %s1898_s21, 3  ;;  %v1713_v32 = vld [vmem:[%s1894_s2] sm:$0xff]  ;;  %vm566_vm2 = vcmask 392192   ;;  %v1722_v43 = vld [vmem:[%s1894_s2 + $0x8] sm:$0xff]  ;;  %v1727_v44 = vld [vmem:[%s1894_s2 + $0x10] sm:$0xff]  ;;  %s1900_s16 = smov (!%p215_p4, %s1663_s16), 1 }
   0xd   : > { %1437 = vmatpush3.msk.msra.mxu0 %vm347_vm0, %v237_v0  ;;  %s207_s25 = scalar_lea.vmem %s1892_s0, %s1279_s22  ;;  %s213_s28 = scalar_lea.vmem %s1893_s1, %s1279_s22  ;;  %1497 = vmatprep.mubr.msk.f32.mxu1 %vm566_vm2, %v1713_v32  ;;  %v1736_v47 = vld [vmem:[%s1894_s2 + $0x18] sm:$0xff]  ;;  %v1741_v48 = vld [vmem:[%s1894_s2 + $0x20] sm:$0xff]  ;;  %v1754_v51 = vld [vmem:[%s1894_s2 + $0x28] sm:$0xff]  ;;  %vm1213_vm3 = vcmask 0  }
   0xe   : > { %1438 = vmatprep.subr.mxu0 %v236_v1  ;;  %v218_v2 = vld [vmem:[%s207_s25] sm:$0xff]  ;;  %v219_v3 = vld [vmem:[%s207_s25 + $0x8] sm:$0xff]  ;;  %v220_v4 = vld [vmem:[%s207_s25 + $0x10] sm:$0xff]  ;;  %s217_s19 = scalar_lea.vmem %s1896_s4, %s1900_s16 }
   0xf   : > { %1439 = vmatpush3.msra.mxu0 %v236_v1  ;;  %1440 = vmatprep.mubr.msk.f32.mxu0 %vm256_vm1, %v218_v2  ;;  %v221_v5 = vld [vmem:[%s207_s25 + $0x18] sm:$0xff]  ;;  %v222_v6 = vld [vmem:[%s207_s25 + $0x20] sm:$0xff]  ;;  %v223_v7 = vld [vmem:[%s207_s25 + $0x28] sm:$0xff]  ;;  %v238_v13 = vmul.f32 %v218_v2, %v218_v2  ;;  %v239_v15 = vmul.f32 %v219_v3, %v219_v3  ;;  %v240_v16 = vmul.f32 %v220_v4, %v220_v4 }
  0x10   : > { %1441 = vmatmul.mubr.msk.f32.vlgmr.msra.gmra.mxu0 %vm256_vm1, %v219_v3  ;;  %v224_v8 = vld [vmem:[%s213_s28] sm:$0xff]  ;;  %v225_v9 = vld [vmem:[%s213_s28 + $0x8] sm:$0xff]  ;;  %v226_v10 = vld [vmem:[%s213_s28 + $0x10] sm:$0xff]  ;;  %v241_v17 = vmul.f32 %v221_v5, %v221_v5  ;;  %v242_v18 = vmul.f32 %v222_v6, %v222_v6  ;;  %v243_v19 = vmul.f32 %v223_v7, %v223_v7 }
  0x11   : > { %1443 = vmatprep.mubr.msk.f32.mxu0 %vm256_vm1, %v220_v4  ;;  %v227_v11 = vld [vmem:[%s213_s28 + $0x18] sm:$0xff]  ;;  %v228_v12 = vld [vmem:[%s213_s28 + $0x20] sm:$0xff]  ;;  %v229_v14 = vld [vmem:[%s213_s28 + $0x28] sm:$0xff]  ;;  %v244_v20 = vmul.f32 %v224_v8, %v224_v8  ;;  %v245_v21 = vmul.f32 %v225_v9, %v225_v9  ;;  %v246_v22 = vmul.f32 %v226_v10, %v226_v10  ;;  %v250_v26 = vmul.f32 %v224_v8, %v218_v2 }
  0x12   : > { %v247_v23 = vmul.f32 %v227_v11, %v227_v11  ;;  %v248_v24 = vmul.f32 %v228_v12, %v228_v12  ;;  %v249_v25 = vmul.f32 %v229_v14, %v229_v14  ;;  %v251_v27 = vmul.f32 %v225_v9, %v219_v3 }
  0x13   : > { %v252_v28 = vmul.f32 %v226_v10, %v220_v4  ;;  %v253_v29 = vmul.f32 %v227_v11, %v221_v5  ;;  %v254_v30 = vmul.f32 %v228_v12, %v222_v6  ;;  %v255_v31 = vmul.f32 %v229_v14, %v223_v7 }
  0x14   : > { %1444 = vmatmul.mubr.msk.f32.gmra.mxu0 %vm256_vm1, %v221_v5 }
  0x15   : > { %1446 = vmatprep.mubr.msk.f32.mxu0 %vm256_vm1, %v222_v6 }
  0x18   : > { %1447 = vmatmul.mubr.msk.f32.gmra.mxu0 %vm256_vm1, %v223_v7 }
  0x19   : > { %1449 = vmatprep.mubr.msk.f32.mxu0 %vm256_vm1, %v224_v8 }
  0x1c   : > { %1450 = vmatmul.mubr.msk.f32.gmra.mxu0 %vm256_vm1, %v225_v9 }
  0x1d   : > { %1452 = vmatprep.mubr.msk.f32.mxu0 %vm256_vm1, %v226_v10 }
  0x20   : > { %1453 = vmatmul.mubr.msk.f32.gmra.mxu0 %vm256_vm1, %v227_v11 }
  0x21   : > { %1455 = vmatprep.mubr.msk.f32.mxu0 %vm256_vm1, %v228_v12 }
  0x24   : > { %1456 = vmatmul.mubr.msk.f32.gmra.mxu0 %vm256_vm1, %v229_v14 }
  0x25   : > { %1458 = vmatprep.mubr.msk.f32.mxu0 %vm256_vm1, %v238_v13 }
  0x28   : > { %1459 = vmatmul.mubr.msk.f32.gmra.mxu0 %vm256_vm1, %v239_v15 }
  0x29   : > { %1461 = vmatprep.mubr.msk.f32.mxu0 %vm256_vm1, %v240_v16 }
  0x2c   : > { %1462 = vmatmul.mubr.msk.f32.gmra.mxu0 %vm256_vm1, %v241_v17 }
  0x2d   : > { %1464 = vmatprep.mubr.msk.f32.mxu0 %vm256_vm1, %v242_v18 }
  0x30   : > { %1465 = vmatmul.mubr.msk.f32.gmra.mxu0 %vm256_vm1, %v243_v19 }
  0x31   : > { %1467 = vmatprep.mubr.msk.f32.mxu0 %vm256_vm1, %v244_v20 }
  0x34   : > { %1468 = vmatmul.mubr.msk.f32.gmra.mxu0 %vm256_vm1, %v245_v21 }
  0x35   : > { %1470 = vmatprep.mubr.msk.f32.mxu0 %vm256_vm1, %v246_v22 }
  0x38   : > { %1471 = vmatmul.mubr.msk.f32.gmra.mxu0 %vm256_vm1, %v247_v23 }
  0x39   : > { %1473 = vmatprep.mubr.msk.f32.mxu0 %vm256_vm1, %v248_v24 }
  0x3c   : > { %1474 = vmatmul.mubr.msk.f32.gmra.mxu0 %vm256_vm1, %v249_v25 }
  0x3d   : > { %1476 = vmatprep.mubr.msk.f32.mxu0 %vm256_vm1, %v250_v26 }
  0x40   : > { %1477 = vmatmul.mubr.msk.f32.gmra.mxu0 %vm256_vm1, %v251_v27 }
  0x41   : > { %1479 = vmatprep.mubr.msk.f32.mxu0 %vm256_vm1, %v252_v28 }
  0x44   : > { %1480 = vmatmul.mubr.msk.f32.gmra.mxu0 %vm256_vm1, %v253_v29 }
  0x45   : > { %1482 = vmatprep.mubr.msk.f32.mxu0 %vm256_vm1, %v254_v30 }
  0x48   : > { %1483 = vmatmul.mubr.msk.f32.gmra.mxu0 %vm256_vm1, %v255_v31 }
  0x49   : > { %1581 = vmatprep.mubr.msk.f32.mxu0 %vm566_vm2, %v1713_v32 }
  0xd0   : > { %v1442_v33 = vpop.f32.mrf.mxu0 }
  0xd2   : > { %v417_v34 = vpop.f32.mrf.mxu0 }
  0xd4   : > { %v1445_v35 = vpop.f32.mrf.mxu0 }
  0xd6   : > { %v427_v36 = vpop.f32.mrf.mxu0 }
  0xd8   : > { %v1448_v37 = vpop.f32.mrf.mxu0 }
  0xd9   : > { %1485 = vmatprep.subr.mxu1 %v1448_v37 }
  0xda   : > { %v437_v38 = vpop.f32.mrf.mxu0  ;;  %1486 = vmatpush3.msra.mxu1 %v1448_v37 }
  0xdb   : > { %1487 = vmatprep.subr.mxu1 %v437_v38 }
  0xdc   : > { %v1451_v39 = vpop.f32.mrf.mxu0  ;;  %1488 = vmatpush3.msra.mxu1 %v437_v38 }
  0xdd   : > { %1489 = vmatprep.subr.mxu1 %v1445_v35 }
  0xde   : > { %v447_v40 = vpop.f32.mrf.mxu0  ;;  %1490 = vmatpush3.msra.mxu1 %v1445_v35 }
  0xdf   : > { %1491 = vmatprep.subr.mxu1 %v427_v36 }
  0xe0   : > { %v1454_v41 = vpop.f32.mrf.mxu0  ;;  %1492 = vmatpush3.msra.mxu1 %v427_v36 }
  0xe1   : > { %1493 = vmatprep.subr.mxu1 %v1442_v33 }
  0xe2   : > { %v457_v42 = vpop.f32.mrf.mxu0  ;;  %1494 = vmatpush3.msra.mxu1 %v1442_v33 }
  0xe3   : > { %1495 = vmatprep.subr.mxu1 %v417_v34 }
  0xe4   : > { %v1457_v45 = vpop.f32.mrf.mxu0  ;;  %1496 = vmatpush3.msra.mxu1 %v417_v34 }
  0xe5   : > { %1506 = vmatprep.subr.mxu1 %v1457_v45  ;;  %1498 = vmatmul.mubr.msk.f32.vlgmr.msra.gmra.mxu1 %vm566_vm2, %v1722_v43 }
  0xe6   : > { %v467_v46 = vpop.f32.mrf.mxu0  ;;  %1507 = vmatpush3.msra.mxu1 %v1457_v45  ;;  %1500 = vmatprep.mubr.msk.f32.mxu1 %vm566_vm2, %v1727_v44 }
  0xe7   : > { %1508 = vmatprep.subr.mxu1 %v467_v46 }
  0xe8   : > { %v1743_v49 = vpop.f32.mrf.mxu0  ;;  %1509 = vmatpush3.msra.mxu1 %v467_v46 }
  0xe9   : > { %1510 = vmatprep.subr.mxu1 %v1454_v41  ;;  %1501 = vmatmul.mubr.msk.f32.gmra.mxu1 %vm566_vm2, %v1736_v47 }
  0xea   : > { %v1747_v50 = vpop.f32.mrf.mxu0  ;;  %1511 = vmatpush3.msra.mxu1 %v1454_v41  ;;  %1503 = vmatprep.mubr.msk.f32.mxu1 %vm566_vm2, %v1741_v48 }
  0xeb   : > { %1512 = vmatprep.subr.mxu1 %v457_v42 }
  0xec   : > { %v1463_v52 = vpop.f32.mrf.mxu0  ;;  %1513 = vmatpush3.msra.mxu1 %v457_v42 }
  0xed   : > { %1514 = vmatprep.subr.mxu1 %v1451_v39  ;;  %1504 = vmatmul.mubr.msk.f32.gmra.mxu1 %vm566_vm2, %v1754_v51 }
  0xee   : > { %v487_v53 = vpop.f32.mrf.mxu0  ;;  %1515 = vmatpush3.msra.mxu1 %v1451_v39  ;;  %1518 = vmatprep.mubr.msk.f32.mxu1 %vm566_vm2, %v1713_v32 }
  0xef   : > { %1516 = vmatprep.subr.mxu1 %v447_v40 }
  0xf0   : > { %v1466_v54 = vpop.f32.mrf.mxu0  ;;  %1517 = vmatpush3.msra.mxu1 %v447_v40 }
  0xf1   : > { %1519 = vmatmul.mubr.msk.f32.vlgmr.msra.gmra.mxu1 %vm566_vm2, %v1722_v43 }
  0xf2   : > { %v497_v55 = vpop.f32.mrf.mxu0  ;;  %1521 = vmatprep.mubr.msk.f32.mxu1 %vm566_vm2, %v1727_v44 }
  0xf4   : > { %v1764_v56 = vpop.f32.mrf.mxu0 }
  0xf5   : > { %1522 = vmatmul.mubr.msk.f32.gmra.mxu1 %vm566_vm2, %v1736_v47 }
  0xf6   : > { %v1768_v57 = vpop.f32.mrf.mxu0  ;;  %1524 = vmatprep.mubr.msk.f32.mxu1 %vm566_vm2, %v1741_v48 }
  0xf8   : > { %v1472_v58 = vpop.f32.mrf.mxu0 }
  0xf9   : > { %1525 = vmatmul.mubr.msk.f32.gmra.mxu1 %vm566_vm2, %v1754_v51 }
  0xfa   : > { %v1774_v59 = vpop.f32.mrf.mxu0  ;;  %1539 = vmatprep.mubr.msk.f32.mxu1 %vm566_vm2, %v1713_v32 }
  0xfc   : > { %v1475_v60 = vpop.f32.mrf.mxu0 }
  0xfd   : > { %1569 = vmatprep.subr.mxu0 %v1475_v60 }
  0xfe   : > { %v527_v61 = vpop.f32.mrf.mxu0  ;;  %1570 = vmatpush3.msra.mxu0 %v1475_v60 }
  0xff   : > { %1571 = vmatprep.subr.mxu0 %v527_v61 }
 0x100   : > { %v1478_v62 = vpop.f32.mrf.mxu0  ;;  %1572 = vmatpush3.msra.mxu0 %v527_v61 }
 0x101   : > { %1573 = vmatprep.subr.mxu0 %v1472_v58 }
 0x102   : > { %v537_v63 = vpop.f32.mrf.mxu0  ;;  %1574 = vmatpush3.msra.mxu0 %v1472_v58 }
 0x103   : > { %1575 = vmatprep.subr.mxu0 %v1774_v59 }
 0x104   : > { %v1481_v0 = vpop.f32.mrf.mxu0  ;;  %1576 = vmatpush3.msra.mxu0 %v1774_v59 }
 0x105   : > { %1577 = vmatprep.subr.mxu0 %v1764_v56 }
 0x106   : > { %v547_v1 = vpop.f32.mrf.mxu0  ;;  %1578 = vmatpush3.msra.mxu0 %v1764_v56 }
 0x107   : > { %1579 = vmatprep.subr.mxu0 %v1768_v57 }
 0x108   : > { %v1484_v2 = vpop.f32.mrf.mxu0  ;;  %1580 = vmatpush3.msra.mxu0 %v1768_v57 }
 0x109   : > { %1527 = vmatprep.subr.mxu1 %v1484_v2  ;;  %1582 = vmatmul.mubr.msk.f32.vlgmr.msra.gmra.mxu0 %vm566_vm2, %v1722_v43 }
 0x10a   : > { %v557_v3 = vpop.f32.mrf.mxu0  ;;  %1528 = vmatpush3.msra.mxu1 %v1484_v2 }
 0x10b   : > { %1529 = vmatprep.subr.mxu1 %v557_v3 }
 0x10c   : > { %1530 = vmatpush3.msra.mxu1 %v557_v3 }
 0x10d   : > { %1531 = vmatprep.subr.mxu1 %v1481_v0 }
 0x10e   : > { %1532 = vmatpush3.msra.mxu1 %v1481_v0 }
 0x10f   : > { %1533 = vmatprep.subr.mxu1 %v547_v1 }
 0x110   : > { %1534 = vmatpush3.msra.mxu1 %v547_v1 }
 0x111   : > { %1535 = vmatprep.subr.mxu1 %v1478_v62 }
 0x112   : > { %1536 = vmatpush3.msra.mxu1 %v1478_v62 }
 0x113   : > { %1537 = vmatprep.subr.mxu1 %v537_v63 }
 0x114   : > { %1538 = vmatpush3.msra.mxu1 %v537_v63 }
 0x115   : > { %1540 = vmatmul.mubr.msk.f32.vlgmr.msra.gmra.mxu1 %vm566_vm2, %v1722_v43  ;;  %1548 = vmatprep.subr.mxu1 %v1466_v54 }
 0x116   : > { %1549 = vmatpush3.msra.mxu1 %v1466_v54  ;;  %1542 = vmatprep.mubr.msk.f32.mxu1 %vm566_vm2, %v1727_v44 }
 0x117   : > { %1550 = vmatprep.subr.mxu1 %v497_v55 }
 0x118   : > { %1551 = vmatpush3.msra.mxu1 %v497_v55 }
 0x119   : > { %1543 = vmatmul.mubr.msk.f32.gmra.mxu1 %vm566_vm2, %v1736_v47  ;;  %1552 = vmatprep.subr.mxu1 %v1463_v52 }
 0x11a   : > { %1553 = vmatpush3.msra.mxu1 %v1463_v52  ;;  %1545 = vmatprep.mubr.msk.f32.mxu1 %vm566_vm2, %v1741_v48 }
 0x11b   : > { %1554 = vmatprep.subr.mxu1 %v487_v53 }
 0x11c   : > { %1555 = vmatpush3.msra.mxu1 %v487_v53 }
 0x11d   : > { %1546 = vmatmul.mubr.msk.f32.gmra.mxu1 %vm566_vm2, %v1754_v51  ;;  %1556 = vmatprep.subr.mxu1 %v1743_v49 }
 0x11e   : > { %1557 = vmatpush3.msra.mxu1 %v1743_v49  ;;  %1560 = vmatprep.mubr.msk.f32.mxu1 %vm566_vm2, %v1713_v32 }
 0x11f   : > { %1558 = vmatprep.subr.mxu1 %v1747_v50 }
 0x120   : > { %1559 = vmatpush3.msra.mxu1 %v1747_v50 }
 0x121   : > { %1561 = vmatmul.mubr.msk.f32.vlgmr.msra.gmra.mxu1 %vm566_vm2, %v1722_v43  ;;  %1590 = vmatprep.subr.mxu1 %v1475_v60 }
 0x122   : > { %1596 = vmatpush3.msra.mxu1 %v1475_v60  ;;  %1563 = vmatprep.mubr.msk.f32.mxu1 %vm566_vm2, %v1727_v44 }
 0x123   : > { %1591 = vmatprep.subr.mxu1 %v527_v61 }
 0x124   : > { %1597 = vmatpush3.msra.mxu1 %v527_v61 }
 0x125   : > { %1564 = vmatmul.mubr.msk.f32.gmra.mxu1 %vm566_vm2, %v1736_v47  ;;  %1592 = vmatprep.subr.mxu1 %v1472_v58 }
 0x126   : > { %1598 = vmatpush3.msra.mxu1 %v1472_v58  ;;  %1566 = vmatprep.mubr.msk.f32.mxu1 %vm566_vm2, %v1741_v48 }
 0x127   : > { %1593 = vmatprep.subr.mxu1 %v1774_v59 }
 0x128   : > { %1599 = vmatpush3.msra.mxu1 %v1774_v59 }
 0x129   : > { %1567 = vmatmul.mubr.msk.f32.gmra.mxu1 %vm566_vm2, %v1754_v51  ;;  %1594 = vmatprep.subr.mxu1 %v1764_v56 }
 0x12a   : > { %1600 = vmatpush3.msra.mxu1 %v1764_v56  ;;  %1584 = vmatprep.mubr.msk.f32.mxu1 %vm566_vm2, %v1727_v44 }
 0x12b   : > { %1595 = vmatprep.subr.mxu1 %v1768_v57 }
 0x12c   : > { %1601 = vmatpush3.msra.mxu1 %v1768_v57 }
 0x12d   : > { %1585 = vmatmul.mubr.msk.f32.vlgmr.msra.gmra.mxu1 %vm566_vm2, %v1736_v47 }
 0x12e   : > { %1587 = vmatprep.mubr.msk.f32.mxu1 %vm566_vm2, %v1741_v48 }
 0x131   : > { %1588 = vmatmul.mubr.msk.f32.gmra.mxu1 %vm566_vm2, %v1754_v51 }
 0x1a5   : > { %v1499_v4 = vpop.f32.mrf.mxu1 }
 0x1a6   : > { %v782_v22 = vmul.f32 %v1499_v4, %v1499_v4 }
 0x1a7   : > { %v651_v5 = vpop.f32.mrf.mxu1 }
 0x1a8   : > { %v781_v25 = vmul.f32 %v651_v5, %v651_v5 }
 0x1a9   : > { %v1826_v6 = vpop.f32.mrf.mxu1 }
 0x1aa   : > { %v784_v43 = vmul.f32 %v1826_v6, %v1826_v6 }
 0x1ab   : > { %v1828_v7 = vpop.f32.mrf.mxu1 }
 0x1ac   : > { %v783_v47 = vmul.f32 %v1828_v7, %v1828_v7 }
 0x1ad   : > { %v1830_v8 = vpop.f32.mrf.mxu1 }
 0x1ae   : > { %v786_v57 = vmul.f32 %v1830_v8, %v1830_v8 }
 0x1af   : > { %v1832_v9 = vpop.f32.mrf.mxu1 }
 0x1b0   : > { %v785_v62 = vmul.f32 %v1832_v9, %v1832_v9 }
 0x1b1   : > { %v1520_v10 = vpop.f32.mrf.mxu1 }
 0x1b2   : > { %v788_v23 = vmul.f32 %v1520_v10, %v1520_v10  ;;  %v776_v41 = vmul.f32 %v1520_v10, %v1499_v4 }
 0x1b3   : > { %v746_v11 = vpop.f32.mrf.mxu1 }
 0x1b4   : > { %v787_v26 = vmul.f32 %v746_v11, %v746_v11  ;;  %v925_v29 = vadd.f32 %v788_v23, %v782_v22  ;;  %v775_v48 = vmul.f32 %v746_v11, %v651_v5  ;;  %v895_v53 = vmul.f32 2.0, %v776_v41 }
 0x1b5   : > { %v1834_v12 = vpop.f32.mrf.mxu1 }
 0x1b6   : > { %v924_v33 = vadd.f32 %v787_v26, %v781_v25  ;;  %v931_v38 = vadd.f32 0.0001, %v925_v29  ;;  %v790_v49 = vmul.f32 %v1834_v12, %v1834_v12  ;;  %v901_v1 = vadd.f32 0.0001, %v895_v53 }
 0x1b7   : > { %v1836_v13 = vpop.f32.mrf.mxu1  ;;  %v894_v10 = vmul.f32 2.0, %v775_v48 }
 0x1b8   : > { %v930_v44 = vadd.f32 0.0001, %v924_v33  ;;  %v789_v50 = vmul.f32 %v1836_v13, %v1836_v13  ;;  %v927_v58 = vadd.f32 %v790_v49, %v784_v43 }
 0x1b9   : > { %v1838_v14 = vpop.f32.mrf.mxu1 }
 0x1ba   : > { %v926_v59 = vadd.f32 %v789_v50, %v783_v47  ;;  %v792_v60 = vmul.f32 %v1838_v14, %v1838_v14 }
 0x1bb   : > { %v1840_v15 = vpop.f32.mrf.mxu1 }
 0x1bc   : > { %v791_v2 = vmul.f32 %v1840_v15, %v1840_v15 }
 0x1c9   : > { %v1583_v20 = vpop.f32.mrf.mxu0 }
 0x1ca   : > { %v1133_v30 = vsub.f32 %v1583_v20, %v788_v23  ;;  %v778_v20 = vmul.f32 %v1834_v12, %v1826_v6  ;;  %v932_v23 = vadd.f32 0.0001, %v926_v59  ;;  %v777_v6 = vmul.f32 %v1836_v13, %v1828_v7 }
 0x1cb   : > { %v1103_v27 = vpop.f32.mrf.mxu0  ;;  %v779_v13 = vmul.f32 %v1840_v15, %v1832_v9 }
 0x1cc   : > { %v1132_v34 = vsub.f32 %v1103_v27, %v787_v26  ;;  %v896_v59 = vmul.f32 2.0, %v777_v6 }
 0x1d5   : > { %v1541_v16 = vpop.f32.mrf.mxu1 }
 0x1d6   : > { %v889_v54 = vsub.f32 %v1541_v16, %v776_v41 }
 0x1d7   : > { %v859_v17 = vpop.f32.mrf.mxu1 }
 0x1d8   : > { %v888_v55 = vsub.f32 %v859_v17, %v775_v48  ;;  %v907_v3 = vmul.f32 2.0, %v889_v54 }
 0x1d9   : > { %v1842_v18 = vpop.f32.mrf.mxu1 }
 0x1da   : > { %v906_v4 = vmul.f32 2.0, %v888_v55  ;;  %v891_v41 = vsub.f32 %v1842_v18, %v778_v20 }
 0x1db   : > { %v1844_v19 = vpop.f32.mrf.mxu1 }
 0x1dc   : > { %v912_v33 = vadd.f32 0.0009, %v906_v4  ;;  %v909_v18 = vmul.f32 2.0, %v891_v41 }
 0x1dd   : > { %v1846_v21 = vpop.f32.mrf.mxu1 }
 0x1df   : > { %v1848_v24 = vpop.f32.mrf.mxu1 }
 0x1e1   : > { %v1562_v28 = vpop.f32.mrf.mxu1 }
 0x1e2   : > { %v1032_v31 = vsub.f32 %v1562_v28, %v782_v22  ;;  %v933_v22 = vadd.f32 0.0001, %v927_v58 }
 0x1e3   : > { %v1002_v32 = vpop.f32.mrf.mxu1 }
 0x1e4   : > { %v1139_v35 = vadd.f32 %v1133_v30, %v1032_v31  ;;  %v1031_v36 = vsub.f32 %v1002_v32, %v781_v25  ;;  %v929_v25 = vadd.f32 %v792_v60, %v786_v57  ;;  %v928_v31 = vadd.f32 %v791_v2, %v785_v62 }
 0x1e5   : > { %v1565_v37 = vpop.f32.mrf.mxu1  ;;  %v913_v32 = vadd.f32 0.0009, %v907_v3 }
 0x1e6   : > { %v1145_v39 = vadd.f32 0.0009, %v1139_v35  ;;  %v1138_v40 = vadd.f32 %v1132_v34, %v1031_v36  ;;  %v1034_v63 = vsub.f32 %v1565_v37, %v784_v43  ;;  %v935_v12 = vadd.f32 0.0001, %v929_v25 }
 0x1e7   : > { %v1012_v42 = vpop.f32.mrf.mxu1  ;;  %v919_v48 = vmul.f32 %v913_v32, %v901_v1  ;;  %v898_v1 = vmul.f32 2.0, %v779_v13 }
 0x1e8   : > { %v1151_v45 = vmul.f32 %v1145_v39, %v931_v38  ;;  %v1144_v46 = vadd.f32 0.0009, %v1138_v40  ;;  %v1033_v11 = vsub.f32 %v1012_v42, %v783_v47  ;;  %v900_v40 = vadd.f32 0.0001, %v894_v10 }
 0x1e9   : > { %v1568_v51 = vpop.f32.mrf.mxu1  ;;  %v934_v47 = vadd.f32 0.0001, %v928_v31 }
 0x1ea   : > { %1612 = vrcp.f32 %v1151_v45  ;;  %v1150_v52 = vmul.f32 %v1144_v46, %v930_v44  ;;  %v1036_v27 = vsub.f32 %v1568_v51, %v786_v57  ;;  %v780_v46 = vmul.f32 %v1838_v14, %v1830_v8 }
 0x1eb   : > { %v1022_v56 = vpop.f32.mrf.mxu1  ;;  %v892_v8 = vsub.f32 %v1848_v24, %v779_v13  ;;  %v897_v14 = vmul.f32 2.0, %v778_v20 }
 0x1ec   : > { %1614 = vrcp.f32 %v1150_v52  ;;  %v1035_v34 = vsub.f32 %v1022_v56, %v785_v62  ;;  %v893_v54 = vsub.f32 %v1846_v21, %v780_v46  ;;  %v899_v9 = vmul.f32 2.0, %v780_v46 }
 0x1ed   : > { %v1586_v61 = vpop.f32.mrf.mxu1  ;;  %v910_v62 = vmul.f32 2.0, %v892_v8 }
 0x1ee   : > { %v1135_v0 = vsub.f32 %v1586_v61, %v790_v49  ;;  %v890_v49 = vsub.f32 %v1844_v19, %v777_v6  ;;  %v911_v61 = vmul.f32 2.0, %v893_v54  ;;  %v905_v10 = vadd.f32 0.0001, %v899_v9 }
 0x1ef   : > { %v1113_v5 = vpop.f32.mrf.mxu1  ;;  %v916_v24 = vadd.f32 0.0009, %v910_v62 }
 0x1f0   : > { %v1141_v16 = vadd.f32 %v1135_v0, %v1034_v63  ;;  %v1134_v17 = vsub.f32 %v1113_v5, %v789_v50  ;;  %v918_v50 = vmul.f32 %v912_v33, %v900_v40  ;;  %v908_v57 = vmul.f32 2.0, %v890_v49 }
 0x1f1   : > { %v1589_v26 = vpop.f32.mrf.mxu1  ;;  %v903_v63 = vadd.f32 0.0001, %v897_v14  ;;  %v917_v4 = vadd.f32 0.0009, %v911_v61 }
 0x1f2   : > { %v1147_v28 = vadd.f32 0.0009, %v1141_v16  ;;  %v1140_v29 = vadd.f32 %v1134_v17, %v1033_v11  ;;  %v1137_v30 = vsub.f32 %v1589_v26, %v792_v60  ;;  %v915_v60 = vadd.f32 0.0009, %v909_v18 }
 0x1f3   : > { %v1123_v35 = vpop.f32.mrf.mxu1  ;;  %v914_v15 = vadd.f32 0.0009, %v908_v57  ;;  %v923_v25 = vmul.f32 %v917_v4, %v905_v10 }
 0x1f4   : > { %v1153_v36 = vmul.f32 %v1147_v28, %v933_v22  ;;  %v1146_v37 = vadd.f32 0.0009, %v1140_v29  ;;  %v1143_v38 = vadd.f32 %v1137_v30, %v1036_v27  ;;  %v1136_v39 = vsub.f32 %v1123_v35, %v791_v2 }
 0x1f5   : > { %v902_v2 = vadd.f32 0.0001, %v896_v59  ;;  %v921_v3 = vmul.f32 %v915_v60, %v903_v63  ;;  %v904_v22 = vadd.f32 0.0001, %v898_v1 }
 0x1f6   : > { %1616 = vrcp.f32 %v1153_v36  ;;  %v1152_v42 = vmul.f32 %v1146_v37, %v932_v23  ;;  %v1149_v43 = vadd.f32 0.0009, %v1143_v38  ;;  %v1142_v44 = vadd.f32 %v1136_v39, %v1035_v34 }
 0x1f7   : > { %v1613_v45 = vpop.eup %1612  ;;  %v920_v11 = vmul.f32 %v914_v15, %v902_v2  ;;  %v922_v29 = vmul.f32 %v916_v24, %v904_v22 }
 0x1f8   : > { %1618 = vrcp.f32 %v1152_v42  ;;  %v1155_v51 = vmul.f32 %v1149_v43, %v935_v12  ;;  %v1148_v52 = vadd.f32 0.0009, %v1142_v44  ;;  %v1163_v53 = vmul.f32 %v1613_v45, %v919_v48 }
 0x1f9   : > { %v1615_v7 = vpop.eup %1614 }
 0x1fa   : > { %1620 = vrcp.f32 %v1155_v51  ;;  %v1154_v55 = vmul.f32 %v1148_v52, %v934_v47  ;;  %v1162_v56 = vmul.f32 %v1615_v7, %v918_v50  ;;  %v1169_v58 = vsub.f32 1.0, %v1163_v53 }
 0x1fc   : > { %1622 = vrcp.f32 %v1154_v55  ;;  %v1168_v19 = vsub.f32 1.0, %v1162_v56  ;;  %v1175_v21 = vmax.f32 %v1169_v58, 0.0 }
 0x1fe   : > { %v1174_v0 = vmax.f32 %v1168_v19, 0.0  ;;  %v1181_v23 = vmin.f32 %v1175_v21, 1.0 }
 0x200   : > { %v1180_v17 = vmin.f32 %v1174_v0, 1.0  ;;  %v1187_v35 = vmul.f32 0.5, %v1181_v23 }
 0x202   : > { %v1186_v33 = vmul.f32 0.5, %v1180_v17  ;;  %v1193_v42 = vsel %vm256_vm1, %v1187_v35, 0.0 }
 0x203   : > { %v1617_v5 = vpop.eup %1616 }
 0x204   : > { %v1165_v16 = vmul.f32 %v1617_v5, %v921_v3  ;;  %v1192_v41 = vsel %vm256_vm1, %v1186_v33, 0.0 }
 0x205   : > { %v1619_v20 = vpop.eup %1618  ;;  %v1194_v47 = vadd.f32 %v1193_v42, %v1192_v41 }
 0x206   : > { %v1164_v26 = vmul.f32 %v1619_v20, %v920_v11  ;;  %v1171_v27 = vsub.f32 1.0, %v1165_v16 }
 0x207   : > { %v1621_v28 = vpop.eup %1620 }
 0x208   : > { %v1167_v30 = vmul.f32 %v1621_v28, %v923_v25  ;;  %v1170_v31 = vsub.f32 1.0, %v1164_v26  ;;  %v1177_v32 = vmax.f32 %v1171_v27, 0.0 }
 0x209   : > { %v1623_v34 = vpop.eup %1622 }
 0x20a   : > { %v1166_v36 = vmul.f32 %v1623_v34, %v922_v29  ;;  %v1173_v37 = vsub.f32 1.0, %v1167_v30  ;;  %v1176_v38 = vmax.f32 %v1170_v31, 0.0  ;;  %v1183_v39 = vmin.f32 %v1177_v32, 1.0 }
 0x20c   : > { %v1172_v40 = vsub.f32 1.0, %v1166_v36  ;;  %v1179_v6 = vmax.f32 %v1173_v37, 0.0  ;;  %v1182_v12 = vmin.f32 %v1176_v38, 1.0  ;;  %v1189_v46 = vmul.f32 0.5, %v1183_v39 }
 0x20e   : > { %v1178_v43 = vmax.f32 %v1172_v40, 0.0  ;;  %v1185_v44 = vmin.f32 %v1179_v6, 1.0  ;;  %v1188_v45 = vmul.f32 0.5, %v1182_v12  ;;  %v1197_v7 = vsel %vm256_vm1, %v1189_v46, 0.0 }
 0x210   : > { %v1184_v48 = vmin.f32 %v1178_v43, 1.0  ;;  %v1195_v49 = vsel %vm256_vm1, %v1188_v45, 0.0  ;;  %v1191_v52 = vmul.f32 0.5, %v1185_v44 }
 0x211   : > { %v1196_v50 = vadd.f32 %v1195_v49, %v1194_v47 }
 0x212   : > { %v1190_v51 = vmul.f32 0.5, %v1184_v48  ;;  %v1201_v54 = vsel %vm256_vm1, %v1191_v52, 0.0 }
 0x213   : > { %v1198_v13 = vadd.f32 %v1197_v7, %v1196_v50 }
 0x214   : > { %v1199_v18 = vsel %vm256_vm1, %v1190_v51, 0.0 }
 0x215   : > { %v1200_v53 = vadd.f32 %v1199_v18, %v1198_v13 }
 0x217   : > { %v1202_v55 = vadd.f32 %v1201_v54, %v1200_v53 }
 0x219   : > { %1203 = vadd.xlane.f32.xlu0 %v1202_v55 }
 0x2a2   : > { %v1204_v56 = vpop.xlane.xlu0 %1203 }
 0x2a3   : > { %v1205_v8 = vrot.slane %v1204_v56, 4 }
 0x2a5   : > { %v1206_v14 = vadd.f32 %v1205_v8, %v1204_v56 }
 0x2a7   : > { %v1207_v57 = vrot.slane %v1206_v14, 2 }
 0x2a9   : > { %v1208_v19 = vadd.f32 %v1207_v57, %v1206_v14 }
 0x2ab   : > { %v1209_v58 = vrot.slane %v1208_v19, 1 }
 0x2ad   : > { %v1210_v59 = vadd.f32 %v1209_v58, %v1208_v19 }
 0x2af   : > { %1602 = vpush %v1210_v59 }
 0x2e0   : > { %s1603_s20 = spop %1602 }
 0x2e1   : > { %v1212_v60 = vstv %s1603_s20 }
 0x2e2   : > { %1214 = vst.msk [vmem:[%s217_s19] sm:$0x1] %vm1213_vm3, %v1212_v60 }
 0x2e3 PF: > { %s14_s15 = sadd.s32 1, %s1630_s15  }
 0x2e4   : > { %p11_p5 = scmp.ge.s32.totalorder %s14_s15, 4  }
 0x2e6   :  { %13 = sbr.rel (!%p11_p5) target bundleno = 1 (0x1), region = 69 }

</bundles_post_ra>
